<compile_context>
chip_gen: v5e
topology: v5e:2x2
jax: 0.10.0
libtpu: 0.0.40
codegen_flags: <defaults>
</compile_context>

<pallas_src>
import functools

import jax
import jax.numpy as jnp
from jax.experimental import pallas as pl
from jax.experimental.pallas import tpu as pltpu

_IN_DIM = 512
_HIDDEN_PAD = 128   # hidden 64 padded to a full lane width
_OUT_PAD = 128      # num_labels padded to a full lane width
_NEG = -1e30        # bias for padded output lanes (suppressed in softmax)


def _round_up(x, m):
    return (x + m - 1) // m * m


def _logits_kernel(x_ref, w1_ref, b1_ref, w2_ref, b2_ref, out_ref):
    # linear(512 -> 128 padded) + ReLU   (MXU + VPU, f32 accumulation)
    h = jnp.dot(x_ref[...], w1_ref[...], preferred_element_type=jnp.float32)
    h = jnp.maximum(h + b1_ref[...], 0.0)
    # classifier(128 padded -> 128 padded)
    logits = jnp.dot(h.astype(w2_ref.dtype), w2_ref[...],
                     preferred_element_type=jnp.float32) + b2_ref[...]
    out_ref[...] = logits


def _gumbel_kernel(x_ref, w1_ref, b1_ref, w2_ref, b2_ref, g_ref, out_ref, *,
                   inv_tau):
    h = jnp.dot(x_ref[...], w1_ref[...], preferred_element_type=jnp.float32)
    h = jnp.maximum(h + b1_ref[...], 0.0)
    logits = jnp.dot(h.astype(w2_ref.dtype), w2_ref[...],
                     preferred_element_type=jnp.float32) + b2_ref[...]
    # gumbel_softmax (soft, hard=False): softmax((logits + g) / tau).
    # Padded lanes carry a -1e30 bias so exp() underflows to 0 there.
    y = (logits + g_ref[...]) * jnp.float32(inv_tau)
    y = y - jnp.max(y, axis=-1, keepdims=True)
    e = jnp.exp(y)
    out_ref[...] = e / jnp.sum(e, axis=-1, keepdims=True)


def swin_affwild_head(features, w1, b1, w2, b2, *, tau, is_trg_task,
                      rng_key=None, block_b=512):
    """Fused classification head.

    features: [B, 512] float32 (output of the external Swin backbone)
    w1: [512, 64], b1: [64]; w2: [64, num_labels], b2: [num_labels]
    Returns [B, num_labels] logits, or gumbel-softmax probs if is_trg_task.
    """
    B, D = features.shape
    assert D == _IN_DIM
    hidden = w1.shape[1]
    num_labels = w2.shape[1]
    assert hidden <= _HIDDEN_PAD and num_labels <= _OUT_PAD

    # --- batch tiling: tile rows, pad B up to a multiple of the tile ---
    # block_b=512 keeps 2x double-buffered tiles + weights well under the
    # 32 MiB scoped VMEM on every generation (v5e/v6e/v7x).
    tm = min(int(block_b), _round_up(B, 8))
    Bp = _round_up(B, tm)

    xf = features.astype(jnp.bfloat16)
    if Bp != B:
        xf = jnp.pad(xf, ((0, Bp - B), (0, 0)))

    # --- lane-pad weights (bf16 matmul inputs, f32 biases) ---
    w1p = jnp.zeros((_IN_DIM, _HIDDEN_PAD), jnp.bfloat16
                    ).at[:, :hidden].set(w1.astype(jnp.bfloat16))
    b1p = jnp.zeros((1, _HIDDEN_PAD), jnp.float32
                    ).at[0, :hidden].set(b1.reshape(-1).astype(jnp.float32))
    w2p = jnp.zeros((_HIDDEN_PAD, _OUT_PAD), jnp.bfloat16
                    ).at[:hidden, :num_labels].set(w2.astype(jnp.bfloat16))
    b2p = jnp.full((1, _OUT_PAD), _NEG, jnp.float32
                   ).at[0, :num_labels].set(b2.reshape(-1).astype(jnp.float32))

    grid = (Bp // tm,)
    x_spec = pl.BlockSpec((tm, _IN_DIM), lambda i: (i, 0))
    w1_spec = pl.BlockSpec((_IN_DIM, _HIDDEN_PAD), lambda i: (0, 0))
    b1_spec = pl.BlockSpec((1, _HIDDEN_PAD), lambda i: (0, 0))
    w2_spec = pl.BlockSpec((_HIDDEN_PAD, _OUT_PAD), lambda i: (0, 0))
    b2_spec = pl.BlockSpec((1, _OUT_PAD), lambda i: (0, 0))
    out_spec = pl.BlockSpec((tm, _OUT_PAD), lambda i: (i, 0))
    out_shape = jax.ShapeDtypeStruct((Bp, _OUT_PAD), jnp.float32)
    cparams = pltpu.CompilerParams(dimension_semantics=("parallel",))

    if is_trg_task:
        if rng_key is None:
            rng_key = jax.random.PRNGKey(0)
        # Gumbel(0,1) noise; only the first num_labels lanes matter (padded
        # lanes are killed by the -1e30 bias).
        g = jax.random.gumbel(rng_key, (Bp, _OUT_PAD), dtype=jnp.float32)
        g_spec = pl.BlockSpec((tm, _OUT_PAD), lambda i: (i, 0))
        kernel = functools.partial(_gumbel_kernel, inv_tau=1.0 / float(tau))
        out = pl.pallas_call(
            kernel,
            grid=grid,
            in_specs=[x_spec, w1_spec, b1_spec, w2_spec, b2_spec, g_spec],
            out_specs=out_spec,
            out_shape=out_shape,
            compiler_params=cparams,
        )(xf, w1p, b1p, w2p, b2p, g)
    else:
        out = pl.pallas_call(
            _logits_kernel,
            grid=grid,
            in_specs=[x_spec, w1_spec, b1_spec, w2_spec, b2_spec],
            out_specs=out_spec,
            out_shape=out_shape,
            compiler_params=cparams,
        )(xf, w1p, b1p, w2p, b2p)

    return out[:B, :num_labels]


def _init_params(key, num_labels):
    """Deterministic init mimicking nn.Linear defaults (U(-1/sqrt(fan_in), +))."""
    k1, k2, k3, k4 = jax.random.split(key, 4)
    bound1 = 1.0 / jnp.sqrt(512.0)
    bound2 = 1.0 / jnp.sqrt(64.0)
    w1 = jax.random.uniform(k1, (512, 64), jnp.float32, -bound1, bound1)
    b1 = jax.random.uniform(k2, (64,), jnp.float32, -bound1, bound1)
    w2 = jax.random.uniform(k3, (64, num_labels), jnp.float32, -bound2, bound2)
    b2 = jax.random.uniform(k4, (num_labels,), jnp.float32, -bound2, bound2)
    return w1, b1, w2, b2


if __name__ == "__main__":
    B = 8
    NUM_LABELS = 8
    TAU = 1.0

    key = jax.random.PRNGKey(0)
    kx, kp, kg = jax.random.split(key, 3)
    # Stand-in for the Swin backbone's 512-d pooled output features.
    features = jax.random.normal(kx, (B, 512), dtype=jnp.float32)
    w1, b1, w2, b2 = _init_params(kp, NUM_LABELS)

    # Path 1: is_trg_task=False -> plain logits; check against a pure-JAX
    # reference that applies the same bf16 input casts (f32 accumulation).
    logits = swin_affwild_head(features, w1, b1, w2, b2,
                               tau=TAU, is_trg_task=False)
    logits = jax.block_until_ready(logits)

    xb = features.astype(jnp.bfloat16)
    h_ref = jnp.maximum(
        jnp.dot(xb, w1.astype(jnp.bfloat16),
                preferred_element_type=jnp.float32) + b1, 0.0)
    logits_ref = jnp.dot(h_ref.astype(jnp.bfloat16), w2.astype(jnp.bfloat16),
                         preferred_element_type=jnp.float32) + b2
    assert logits.shape == (B, NUM_LABELS)
    assert jnp.allclose(logits, logits_ref, atol=2e-3, rtol=2e-3), "logits mismatch"

    # Path 2: is_trg_task=True -> gumbel softmax; rows must be valid distributions.
    probs = swin_affwild_head(features, w1, b1, w2, b2,
                              tau=TAU, is_trg_task=True, rng_key=kg)
    probs = jax.block_until_ready(probs)
    assert probs.shape == (B, NUM_LABELS)
    assert bool(jnp.all(probs >= 0.0))
    assert jnp.allclose(jnp.sum(probs, axis=-1), 1.0, atol=1e-4), "probs not normalized"

    print("KERNEL_OK")
</pallas_src>

<mosaic_0001>
module attributes {stable_mosaic.version = 11 : i64} {
  func.func @_logits_kernel(%arg0: i32, %arg1: memref<8x512xbf16, #tpu.memory_space<vmem>>, %arg2: memref<512x128xbf16, #tpu.memory_space<vmem>>, %arg3: memref<1x128xf32, #tpu.memory_space<vmem>>, %arg4: memref<128x128xbf16, #tpu.memory_space<vmem>>, %arg5: memref<1x128xf32, #tpu.memory_space<vmem>>, %arg6: memref<8x128xf32, #tpu.memory_space<vmem>>) attributes {dimension_semantics = [#tpu.dimension_semantics<parallel>], iteration_bounds = array<i64: 1>, scalar_prefetch = 0 : i64, scratch_operands = 0 : i64, tpu.core_type = #tpu.core_type<tc>, window_params = [{transform_indices = @transform_0, window_bounds = array<i64: 8, 512>}, {pipeline_mode = #tpu.pipeline_mode<synchronous>, transform_indices = @transform_1, window_bounds = array<i64: 512, 128>}, {pipeline_mode = #tpu.pipeline_mode<synchronous>, transform_indices = @transform_2, window_bounds = array<i64: 1, 128>}, {pipeline_mode = #tpu.pipeline_mode<synchronous>, transform_indices = @transform_3, window_bounds = array<i64: 128, 128>}, {pipeline_mode = #tpu.pipeline_mode<synchronous>, transform_indices = @transform_4, window_bounds = array<i64: 1, 128>}, {transform_indices = @transform_5, window_bounds = array<i64: 8, 128>}]} {
    %c0 = arith.constant 0 : index
    %c0_0 = arith.constant 0 : index
    %0 = vector.load %arg1[%c0, %c0_0] : memref<8x512xbf16, #tpu.memory_space<vmem>>, vector<8x512xbf16>
    %c0_1 = arith.constant 0 : index
    %c0_2 = arith.constant 0 : index
    %1 = vector.load %arg2[%c0_1, %c0_2] : memref<512x128xbf16, #tpu.memory_space<vmem>>, vector<512x128xbf16>
    %cst = arith.constant dense<0.000000e+00> : vector<8x128xf32>
    %2 = tpu.matmul %0, %1, %cst {dimension_numbers = #tpu.dot_dimension_numbers<[1], [0], [0], [1], [0, 0, 1, 1], [], []>} : vector<8x512xbf16>, vector<512x128xbf16>, vector<8x128xf32> -> vector<8x128xf32>
    %c0_3 = arith.constant 0 : index
    %c0_4 = arith.constant 0 : index
    %3 = vector.load %arg3[%c0_3, %c0_4] : memref<1x128xf32, #tpu.memory_space<vmem>>, vector<1x128xf32>
    %4 = vector.broadcast %3 : vector<1x128xf32> to vector<8x128xf32>
    %5 = arith.addf %2, %4 : vector<8x128xf32>
    %cst_5 = arith.constant 0.000000e+00 : f32
    %6 = vector.broadcast %cst_5 : f32 to vector<8x128xf32>
    %7 = arith.maximumf %5, %6 : vector<8x128xf32>
    %8 = arith.truncf %7 : vector<8x128xf32> to vector<8x128xbf16>
    %c0_6 = arith.constant 0 : index
    %c0_7 = arith.constant 0 : index
    %9 = vector.load %arg4[%c0_6, %c0_7] : memref<128x128xbf16, #tpu.memory_space<vmem>>, vector<128x128xbf16>
    %cst_8 = arith.constant dense<0.000000e+00> : vector<8x128xf32>
    %10 = tpu.matmul %8, %9, %cst_8 {dimension_numbers = #tpu.dot_dimension_numbers<[1], [0], [0], [1], [0, 0, 1, 1], [], []>} : vector<8x128xbf16>, vector<128x128xbf16>, vector<8x128xf32> -> vector<8x128xf32>
    %c0_9 = arith.constant 0 : index
    %c0_10 = arith.constant 0 : index
    %11 = vector.load %arg5[%c0_9, %c0_10] : memref<1x128xf32, #tpu.memory_space<vmem>>, vector<1x128xf32>
    %12 = vector.broadcast %11 : vector<1x128xf32> to vector<8x128xf32>
    %13 = arith.addf %10, %12 : vector<8x128xf32>
    %c0_11 = arith.constant 0 : index
    %c0_12 = arith.constant 0 : index
    %14 = vector.load %arg6[%c0_11, %c0_12] : memref<8x128xf32, #tpu.memory_space<vmem>>, vector<8x128xf32>
    tpu.vector_store %arg6[%c0_11, %c0_12], %13 {strides = array<i32>} : memref<8x128xf32, #tpu.memory_space<vmem>>, vector<8x128xf32>,
    return
  }
  func.func @transform_0(%arg0: i32) -> (i32, i32) {
    %c0_i32 = arith.constant 0 : i32
    %c0_i32_0 = arith.constant 0 : i32
    return %arg0, %c0_i32 : i32, i32
  }
  func.func @transform_1(%arg0: i32) -> (i32, i32) {
    %c0_i32 = arith.constant 0 : i32
    %c0_i32_0 = arith.constant 0 : i32
    %c0_i32_1 = arith.constant 0 : i32
    return %c0_i32, %c0_i32_0 : i32, i32
  }
  func.func @transform_2(%arg0: i32) -> (i32, i32) {
    %c0_i32 = arith.constant 0 : i32
    %c0_i32_0 = arith.constant 0 : i32
    %c0_i32_1 = arith.constant 0 : i32
    return %c0_i32, %c0_i32_0 : i32, i32
  }
  func.func @transform_3(%arg0: i32) -> (i32, i32) {
    %c0_i32 = arith.constant 0 : i32
    %c0_i32_0 = arith.constant 0 : i32
    %c0_i32_1 = arith.constant 0 : i32
    return %c0_i32, %c0_i32_0 : i32, i32
  }
  func.func @transform_4(%arg0: i32) -> (i32, i32) {
    %c0_i32 = arith.constant 0 : i32
    %c0_i32_0 = arith.constant 0 : i32
    %c0_i32_1 = arith.constant 0 : i32
    return %c0_i32, %c0_i32_0 : i32, i32
  }
  func.func @transform_5(%arg0: i32) -> (i32, i32) {
    %c0_i32 = arith.constant 0 : i32
    %c0_i32_0 = arith.constant 0 : i32
    return %arg0, %c0_i32 : i32, i32
  }
}

</mosaic_0001>

<bundles_post_ra>
// kernel: tpu_custom_call.1
= control target key start
LH: loop header
LB: loop body
LE: loop exit
PB: predicated region body
PF: predicated region fallthrough
CT: control target
= control target key end

     0   :  { %10 = vsyncpa [#allocation3], 0  ;;  %s860_s0 = inlined_call_operand.hbm [shape: bf16[8,512], index: 0, kind: input, shape index: {}]   ;;  %s861_s1 = inlined_call_operand.hbm [shape: bf16[512,128], index: 1, kind: input, shape index: {}]   ;;  %s862_s2 = inlined_call_operand.vmem [shape: f32[1,128], index: 2, kind: input, shape index: {}]   ;;  %s863_s3 = inlined_call_operand.hbm [shape: bf16[128,128], index: 3, kind: input, shape index: {}]   ;;  %s864_s4 = inlined_call_operand.vmem [shape: f32[1,128], index: 4, kind: input, shape index: {}]   ;;  %s865_s5 = inlined_call_operand.hbm [shape: f32[8,128], index: 5, kind: output, shape index: {}]  }
   0x1   :  { %11 = vsyncpa [#allocation6], 0  ;;  %s28_s20 = sshll.u32 %s861_s1, 4  ;;  %s29_s20 = int_to_ptr.hbm [resolvable:$true] %s28_s20 }
   0x2   :  { %12 = vsyncpa [#allocation4], 0  ;;  %s806_s21 = smov [#allocation5]   ;;  %s18_s25 = sshll.u32 %s860_s0, 4  ;;  %s19_s25 = int_to_ptr.hbm [resolvable:$true] %s18_s25 }
   0x3   :  { %s30_s22 = sshll.u32 %s806_s21, 4  ;;  %s807_s26 = smov 64   ;;  %s31_s22 = int_to_ptr.vmem [resolvable:$true] %s30_s22 }
   0x4   :  { %s808_s27 = smov 4   ;;  %s809_s28 = smov [#allocation2]  }
   0x5   :  { %36 = dma.hbm_to_vmem [thread:$0]  %s29_s20, 4096, %s31_s22, [#allocation6], %s807_s26, %s807_s26, %s808_s27  }
   0x6   :  { %s20_s29 = sshll.u32 %s809_s28, 4  ;;  %s43_s7 = sshll.u32 %s863_s3, 4  ;;  %s21_s29 = int_to_ptr.vmem [resolvable:$true] %s20_s29  ;;  %s44_s7 = int_to_ptr.hbm [resolvable:$true] %s43_s7 }
   0x7   :  { %23 = dma.hbm_to_vmem [thread:$0]  %s19_s25, 256, %s21_s29, [#allocation3]  }
   0x8   :  { %s810_s1 = smov [#allocation7]  }
   0x9   :  { %s45_s8 = sshll.u32 %s810_s1, 4  ;;  %s46_s8 = int_to_ptr.vmem [resolvable:$true] %s45_s8 }
   0xa   :  { %51 = dma.hbm_to_vmem [thread:$0]  %s44_s7, 1024, %s46_s8, [#allocation6], %s807_s26, %s807_s26, %s808_s27  }
   0xb   :  { %800 = dma.done.wait [#allocation3], 256  }
   0xc   :  { %801 = vsyncadd [#allocation3], 4294967040 }
   0xd   :  { %802 = dma.done.wait [#allocation6], 5120  }
   0xe   :  { %803 = vsyncadd [#allocation6], 4294962176  ;;  %v663_v0 = vld [vmem:[#allocation5 + $0x38] sm:$0xff]  ;;  %v662_v4 = vld [vmem:[#allocation5 + $0x30] sm:$0xff]  ;;  %s485_s14 = sshll.u32 %s865_s5, 4  ;;  %s486_s14 = int_to_ptr.hbm [resolvable:$true] %s485_s14 }
   0xf   :  { %v671_v1 = vld [vmem:[#allocation5 + $0x78] sm:$0xff]  ;;  %342 = vmatpush.bf16.msra.mxu0 %v663_v0  ;;  %v670_v5 = vld [vmem:[#allocation5 + $0x70] sm:$0xff]  ;;  %v661_v8 = vld [vmem:[#allocation5 + $0x28] sm:$0xff] }
  0x10   :  { %v679_v2 = vld [vmem:[#allocation5 + $0xb8] sm:$0xff]  ;;  %355 = vmatpush.bf16.msra.mxu1 %v671_v1  ;;  %v678_v6 = vld [vmem:[#allocation5 + $0xb0] sm:$0xff]  ;;  %v669_v9 = vld [vmem:[#allocation5 + $0x68] sm:$0xff] }
  0x11   :  { %v687_v3 = vld [vmem:[#allocation5 + $0xf8] sm:$0xff]  ;;  %368 = vmatpush.bf16.msra.mxu2 %v679_v2  ;;  %v686_v7 = vld [vmem:[#allocation5 + $0xf0] sm:$0xff]  ;;  %v677_v10 = vld [vmem:[#allocation5 + $0xa8] sm:$0xff] }
  0x12   :  { %381 = vmatpush.bf16.msra.mxu3 %v687_v3  ;;  %v685_v11 = vld [vmem:[#allocation5 + $0xe8] sm:$0xff]  ;;  %v660_v12 = vld [vmem:[#allocation5 + $0x20] sm:$0xff]  ;;  %v659_v16 = vld [vmem:[#allocation5 + $0x18] sm:$0xff] }
  0x13   :  { %343 = vmatpush.bf16.msra.mxu0 %v662_v4  ;;  %v668_v13 = vld [vmem:[#allocation5 + $0x60] sm:$0xff]  ;;  %v667_v17 = vld [vmem:[#allocation5 + $0x58] sm:$0xff]  ;;  %v658_v20 = vld [vmem:[#allocation5 + $0x10] sm:$0xff] }
  0x14   :  { %356 = vmatpush.bf16.msra.mxu1 %v670_v5  ;;  %v676_v14 = vld [vmem:[#allocation5 + $0xa0] sm:$0xff]  ;;  %v675_v18 = vld [vmem:[#allocation5 + $0x98] sm:$0xff]  ;;  %v666_v21 = vld [vmem:[#allocation5 + $0x50] sm:$0xff] }
  0x15   :  { %369 = vmatpush.bf16.msra.mxu2 %v678_v6  ;;  %v684_v15 = vld [vmem:[#allocation5 + $0xe0] sm:$0xff]  ;;  %v683_v19 = vld [vmem:[#allocation5 + $0xd8] sm:$0xff]  ;;  %v674_v22 = vld [vmem:[#allocation5 + $0x90] sm:$0xff] }
  0x16   :  { %382 = vmatpush.bf16.msra.mxu3 %v686_v7  ;;  %v682_v23 = vld [vmem:[#allocation5 + $0xd0] sm:$0xff]  ;;  %v657_v24 = vld [vmem:[#allocation5 + $0x8] sm:$0xff]  ;;  %v67_v29 = vld [vmem:[#allocation2 + $0x8] sm:$0xff] }
  0x17   :  { %344 = vmatpush.bf16.msra.mxu0 %v661_v8  ;;  %v665_v25 = vld [vmem:[#allocation5 + $0x48] sm:$0xff]  ;;  %v66_v26 = vld [vmem:[#allocation2] sm:$0xff]  ;;  %v656_v32 = vld [vmem:[#allocation5] sm:$0xff]  ;;  %v140_v34 = vunpack.c.l.b16 %v67_v29  ;;  %v141_v35 = vunpack.c.h.b16 %v67_v29 }
  0x18   :  { %357 = vmatpush.bf16.msra.mxu1 %v669_v9  ;;  %v673_v27 = vld [vmem:[#allocation5 + $0x88] sm:$0xff]  ;;  %v138_v30 = vunpack.c.l.b16 %v66_v26  ;;  %v139_v31 = vunpack.c.h.b16 %v66_v26  ;;  %v664_v33 = vld [vmem:[#allocation5 + $0x40] sm:$0xff]  ;;  %v695_v38 = vld [vmem:[#allocation7 + $0x38] sm:$0xff] }
  0x19   :  { %370 = vmatpush.bf16.msra.mxu2 %v677_v10  ;;  %v681_v28 = vld [vmem:[#allocation5 + $0xc8] sm:$0xff]  ;;  %v672_v36 = vld [vmem:[#allocation5 + $0x80] sm:$0xff]  ;;  %v144_v41 = vpack.c.b16 %v140_v34, %v140_v34  ;;  %v145_v42 = vpack.c.b16 %v141_v35, %v141_v35  ;;  %v694_v43 = vld [vmem:[#allocation7 + $0x30] sm:$0xff] }
  0x1a   :  { %383 = vmatpush.bf16.msra.mxu3 %v685_v11  ;;  %v680_v37 = vld [vmem:[#allocation5 + $0xc0] sm:$0xff]  ;;  %v142_v39 = vpack.c.b16 %v138_v30, %v138_v30  ;;  %v143_v40 = vpack.c.b16 %v139_v31, %v139_v31  ;;  %v693_v44 = vld [vmem:[#allocation7 + $0x28] sm:$0xff]  ;;  %v691_v46 = vld [vmem:[#allocation7 + $0x18] sm:$0xff] }
  0x1b   :  { %345 = vmatpush.bf16.msra.mxu0 %v660_v12  ;;  %v692_v45 = vld [vmem:[#allocation7 + $0x20] sm:$0xff]  ;;  %v690_v47 = vld [vmem:[#allocation7 + $0x10] sm:$0xff]  ;;  %v689_v48 = vld [vmem:[#allocation7 + $0x8] sm:$0xff] }
  0x1c   :  { %358 = vmatpush.bf16.msra.mxu1 %v668_v13  ;;  %v688_v49 = vld [vmem:[#allocation7] sm:$0xff]  ;;  %v702_v50 = vld [vmem:[%s862_s2] ss:$0 sm:$0xff]  ;;  %s811_s2 = smov [#allocation8]  }
  0x1d   :  { %371 = vmatpush.bf16.msra.mxu2 %v676_v14  ;;  %v703_v1 = vld [vmem:[%s864_s4] ss:$0 sm:$0xff]  ;;  %s483_s11 = sshll.u32 %s811_s2, 4  ;;  %s484_s11 = int_to_ptr.vmem [resolvable:$true] %s483_s11 }
  0x1e   :  { %384 = vmatpush.bf16.msra.mxu3 %v684_v15 }
  0x1f   :  { %346 = vmatpush.bf16.msra.mxu0 %v659_v16 }
  0x20   :  { %359 = vmatpush.bf16.msra.mxu1 %v667_v17 }
  0x21   :  { %372 = vmatpush.bf16.msra.mxu2 %v675_v18 }
  0x22   :  { %385 = vmatpush.bf16.msra.mxu3 %v683_v19 }
  0x23   :  { %347 = vmatpush.bf16.msra.mxu0 %v658_v20 }
  0x24   :  { %360 = vmatpush.bf16.msra.mxu1 %v666_v21 }
  0x25   :  { %373 = vmatpush.bf16.msra.mxu2 %v674_v22 }
  0x26   :  { %386 = vmatpush.bf16.msra.mxu3 %v682_v23 }
  0x27   :  { %348 = vmatpush.bf16.msra.mxu0 %v657_v24 }
  0x28   :  { %361 = vmatpush.bf16.msra.mxu1 %v665_v25 }
  0x29   :  { %374 = vmatpush.bf16.msra.mxu2 %v673_v27 }
  0x2a   :  { %387 = vmatpush.bf16.msra.mxu3 %v681_v28 }
  0x2b   :  { %349 = vmatpush.bf16.msra.mxu0 %v656_v32 }
  0x2c   :  { %362 = vmatpush.bf16.msra.mxu1 %v664_v33 }
  0x2d   :  { %375 = vmatpush.bf16.msra.mxu2 %v672_v36 }
  0x2e   :  { %388 = vmatpush.bf16.msra.mxu3 %v680_v37  ;;  %350 = vmatmul.bf16.vlgmr.msra.gmra.mxu0 %v142_v39 }
  0x2f   :  { %464 = vmatpush.bf16.msrb.mxu0 %v695_v38  ;;  %363 = vmatmul.bf16.vlgmr.msra.gmra.mxu1 %v143_v40 }
  0x30   :  { %376 = vmatmul.bf16.vlgmr.msra.gmra.mxu2 %v144_v41 }
  0x31   :  { %389 = vmatmul.bf16.vlgmr.msra.gmra.mxu3 %v145_v42 }
  0x33   :  { %465 = vmatpush.bf16.msrb.mxu0 %v694_v43 }
  0x37   :  { %466 = vmatpush.bf16.msrb.mxu0 %v693_v44 }
  0x3b   :  { %467 = vmatpush.bf16.msrb.mxu0 %v692_v45 }
  0x3f   :  { %468 = vmatpush.bf16.msrb.mxu0 %v691_v46 }
  0x43   :  { %469 = vmatpush.bf16.msrb.mxu0 %v690_v47 }
  0x47   :  { %470 = vmatpush.bf16.msrb.mxu0 %v689_v48 }
  0x4b   :  { %471 = vmatpush.bf16.msrb.mxu0 %v688_v49 }
  0xab   :  { %v351_v51 = vpop.f32.mrf.mxu0 }
  0xac   :  { %v364_v52 = vpop.f32.mrf.mxu1  ;;  %v352_v53 = vadd.f32 %v702_v50, %v351_v51 }
  0xae   :  { %v365_v54 = vadd.f32 %v364_v52, %v352_v53 }
  0xb3   :  { %v377_v55 = vpop.f32.mrf.mxu2  ;;  %v353_v58 = vpop.f32.mrf.mxu0 }
  0xb4   :  { %v390_v56 = vpop.f32.mrf.mxu3  ;;  %v378_v57 = vadd.f32 %v377_v55, %v365_v54  ;;  %v366_v59 = vpop.f32.mrf.mxu1 }
  0xb6   :  { %v391_v60 = vadd.f32 %v390_v56, %v378_v57 }
  0xb8   :  { %v394_v61 = vmax.f32 %v391_v60, 0.0 }
  0xba   :  { %v395_v62 = vpack.c.bf16 %v394_v61, %v394_v61 }
  0xbb   :  { %v379_v63 = vpop.f32.mrf.mxu2 }
  0xbc   :  { %v392_v0 = vpop.f32.mrf.mxu3  ;;  %472 = vmatmul.bf16.vlgmr.msrb.gmra.mxu0 %v395_v62 }
 0x139   :  { %v473_v2 = vpop.f32.mrf.mxu0 }
 0x13a   :  { %v474_v3 = vadd.f32 %v703_v1, %v473_v2 }
 0x13c   :  { %477 = vst [vmem:[#allocation8] sm:$0xff] %v474_v3 }
 0x13d   :  { %488 = dma.vmem_to_hbm [thread:$0]  %s484_s11, 128, %s486_s14, [#allocation4]  }
 0x141   :  { %v475_v4 = vpop.f32.mrf.mxu0 }
 0x142   :  { %804 = dma.done.wait [#allocation4], 128  }
 0x143   :  { %805 = vsyncadd [#allocation4], 4294967168 }
 0x144   :  { %493 = vsyncpa [#allocation3], 1 }
 0x145   :  { %494 = vsyncpa [#allocation6], 1 }
 0x146   :  { %495 = vsyncpa [#allocation4], 1 }

</bundles_post_ra>
